<compile_context>
chip_gen: v7x
topology: tpu7x:2x2x1
jax: 0.10.0
libtpu: 0.0.40
codegen_flags: <defaults>
</compile_context>

<pallas_src>
import jax
import jax.numpy as jnp
from jax import lax
from jax.experimental import pallas as pl
from jax.experimental.pallas import tpu as pltpu

# TODO(synk): self.criterion (nn.MSELoss) is a loss object, not part of forward(); omitted.


def dqn_kernel(p1_ref, w1_ref, b1_ref, w2_ref, b2_ref, fwm_ref, fb_ref, out_ref):
    # p1_ref:  VMEM (12, 27) f32  -- im2col patches of the input for conv1
    # w1_ref:  VMEM (27, 5)  f32  -- conv1 weight, [ic*9+kh*3+kw, oc]
    # b1_ref:  VMEM (1, 5)   f32
    # w2_ref:  VMEM (9, 5, 3) f32 -- conv2 weight, [kh*3+kw][ic, oc]
    # b2_ref:  VMEM (1, 3)   f32
    # fwm_ref: VMEM (2, 3)   f32  -- fc1 weight in [pos, channel] layout
    # fb_ref:  VMEM (1, 1)   f32
    # out_ref: VMEM (1, 1)   f32  -- scalar Q-value, lane-resident

    # ---- conv1: one im2col matmul on the MXU, bias as one vector add ----
    h1 = jnp.dot(p1_ref[...], w1_ref[...], preferred_element_type=jnp.float32)
    h1 = h1 + b1_ref[...]                                   # (12, 5), rows = oh*4+ow

    # ---- conv2: 9 hoisted row-pair slices, 9 accumulated tiny MXU dots ----
    h2 = jnp.dot(h1[0:2, :], w2_ref[0], preferred_element_type=jnp.float32)   # (2, 3)
    for kh in range(3):
        for kw in range(3):
            if kh == 0 and kw == 0:
                continue
            r = kh * 4 + kw
            h2 = h2 + jnp.dot(h1[r:r + 2, :], w2_ref[kh * 3 + kw],
                              preferred_element_type=jnp.float32)
    h2 = h2 + b2_ref[...]                                   # (2, 3), bias in epilogue

    # ---- fc1: elementwise mul + full on-chip reduce, bias fused ----
    out_ref[...] = jnp.sum(h2 * fwm_ref[...], keepdims=True) + fb_ref[...]


def dqn_forward(state, w1, b1, w2, b2, fw, fb):
    """state: (1, 3, 5, 6) f32 NCHW. Returns shape (1,) like the torch module."""
    x = state[0]                                            # (3, 5, 6)

    # im2col for conv1: patches1[oh*4+ow, ic*9+kh*3+kw] = x[ic, oh+kh, ow+kw]
    patches1 = jnp.stack(
        [x[:, kh:kh + 3, kw:kw + 4] for kh in range(3) for kw in range(3)],
        axis=1,                                             # (3, 9, 3, 4) [ic, k, oh, ow]
    ).reshape(27, 12).T                                     # (12, 27)

    # Weight relayouts (pure, one-time, done by XLA outside the kernel).
    w1m = w1.reshape(5, 27).T                               # (27, 5)
    b1v = b1.reshape(1, 5)
    w2m = jnp.transpose(w2, (2, 3, 1, 0)).reshape(9, 5, 3)  # [kh*3+kw][ic, oc]
    b2v = b2.reshape(1, 3)
    fwm = fw.reshape(3, 2).T                                # (2, 3): fwm[p, c] = fw[0, c*2+p]
    fbv = fb.reshape(1, 1)

    vmem = pl.BlockSpec(memory_space=pltpu.MemorySpace.VMEM)
    out = pl.pallas_call(
        dqn_kernel,
        out_shape=jax.ShapeDtypeStruct((1, 1), jnp.float32),
        in_specs=[vmem] * 7,
        out_specs=vmem,
    )(patches1, w1m, b1v, w2m, b2v, fwm, fbv)
    return out.reshape(1)


def dqn_reference(state, w1, b1, w2, b2, fw, fb):
    """Pure-JAX reference mirroring the PyTorch module."""
    dn = ("NCHW", "OIHW", "NCHW")
    h = lax.conv_general_dilated(state, w1, (1, 1), "VALID", dimension_numbers=dn)
    h = h + b1[None, :, None, None]
    h = lax.conv_general_dilated(h, w2, (1, 1), "VALID", dimension_numbers=dn)
    h = h + b2[None, :, None, None]
    flat = h.reshape(1, 6)
    return (flat @ fw.T + fb).reshape(1)


def init_params(key):
    """Deterministic PyTorch-style (kaiming-uniform-ish) init."""
    k1, k2, k3 = jax.random.split(key, 3)

    def uniform(k, shape, fan_in):
        bound = 1.0 / jnp.sqrt(jnp.float32(fan_in))
        return jax.random.uniform(k, shape, jnp.float32, -bound, bound)

    kw1, kb1 = jax.random.split(k1)
    kw2, kb2 = jax.random.split(k2)
    kwf, kbf = jax.random.split(k3)

    w1 = uniform(kw1, (5, 3, 3, 3), 3 * 3 * 3)
    b1 = uniform(kb1, (5,), 3 * 3 * 3)
    w2 = uniform(kw2, (3, 5, 3, 3), 5 * 3 * 3)
    b2 = uniform(kb2, (3,), 5 * 3 * 3)
    fw = uniform(kwf, (1, 6), 6)
    fb = uniform(kbf, (1,), 6)
    return w1, b1, w2, b2, fw, fb


if __name__ == "__main__":
    key = jax.random.PRNGKey(0)
    k_params, k_input = jax.random.split(key)

    w1, b1, w2, b2, fw, fb = init_params(k_params)
    state = jax.random.normal(k_input, (1, 3, 5, 6), jnp.float32)

    out = jax.block_until_ready(dqn_forward(state, w1, b1, w2, b2, fw, fb))
    ref = jax.block_until_ready(dqn_reference(state, w1, b1, w2, b2, fw, fb))

    assert out.shape == (1,), out.shape
    assert jnp.allclose(out, ref, atol=1e-5, rtol=1e-5), (out, ref)
    print("KERNEL_OK")
</pallas_src>

<mosaic_0001>
module attributes {stable_mosaic.version = 11 : i64} {
  func.func @dqn_kernel(%arg0: memref<12x27xf32, #tpu.memory_space<vmem>>, %arg1: memref<27x5xf32, #tpu.memory_space<vmem>>, %arg2: memref<1x5xf32, #tpu.memory_space<vmem>>, %arg3: memref<9x5x3xf32, #tpu.memory_space<vmem>>, %arg4: memref<1x3xf32, #tpu.memory_space<vmem>>, %arg5: memref<2x3xf32, #tpu.memory_space<vmem>>, %arg6: memref<1x1xf32, #tpu.memory_space<vmem>>, %arg7: memref<1x1xf32, #tpu.memory_space<vmem>>) attributes {dimension_semantics = [], scalar_prefetch = 0 : i64, scratch_operands = 0 : i64, tpu.core_type = #tpu.core_type<tc>} {
    %c0 = arith.constant 0 : index
    %c0_0 = arith.constant 0 : index
    %0 = vector.load %arg0[%c0, %c0_0] : memref<12x27xf32, #tpu.memory_space<vmem>>, vector<12x27xf32>
    %c0_1 = arith.constant 0 : index
    %c0_2 = arith.constant 0 : index
    %1 = vector.load %arg1[%c0_1, %c0_2] : memref<27x5xf32, #tpu.memory_space<vmem>>, vector<27x5xf32>
    %cst = arith.constant dense<0.000000e+00> : vector<12x5xf32>
    %2 = tpu.matmul %0, %1, %cst {dimension_numbers = #tpu.dot_dimension_numbers<[1], [0], [0], [1], [0, 0, 1, 1], [], []>} : vector<12x27xf32>, vector<27x5xf32>, vector<12x5xf32> -> vector<12x5xf32>
    %c0_3 = arith.constant 0 : index
    %c0_4 = arith.constant 0 : index
    %3 = vector.load %arg2[%c0_3, %c0_4] : memref<1x5xf32, #tpu.memory_space<vmem>>, vector<1x5xf32>
    %4 = vector.broadcast %3 : vector<1x5xf32> to vector<12x5xf32>
    %5 = arith.addf %2, %4 : vector<12x5xf32>
    %6 = vector.extract_strided_slice %5 {offsets = [0, 0], sizes = [2, 5], strides = [1, 1]} : vector<12x5xf32> to vector<2x5xf32>
    %c0_5 = arith.constant 0 : index
    %c0_6 = arith.constant 0 : index
    %c0_7 = arith.constant 0 : index
    %7 = vector.load %arg3[%c0_5, %c0_6, %c0_7] : memref<9x5x3xf32, #tpu.memory_space<vmem>>, vector<1x5x3xf32>
    %8 = vector.shape_cast %7 : vector<1x5x3xf32> to vector<5x3xf32>
    %cst_8 = arith.constant dense<0.000000e+00> : vector<2x3xf32>
    %9 = tpu.matmul %6, %8, %cst_8 {dimension_numbers = #tpu.dot_dimension_numbers<[1], [0], [0], [1], [0, 0, 1, 1], [], []>} : vector<2x5xf32>, vector<5x3xf32>, vector<2x3xf32> -> vector<2x3xf32>
    %10 = vector.extract_strided_slice %5 {offsets = [1, 0], sizes = [2, 5], strides = [1, 1]} : vector<12x5xf32> to vector<2x5xf32>
    %c1 = arith.constant 1 : index
    %c0_9 = arith.constant 0 : index
    %c0_10 = arith.constant 0 : index
    %11 = vector.load %arg3[%c1, %c0_9, %c0_10] : memref<9x5x3xf32, #tpu.memory_space<vmem>>, vector<1x5x3xf32>
    %12 = vector.shape_cast %11 : vector<1x5x3xf32> to vector<5x3xf32>
    %cst_11 = arith.constant dense<0.000000e+00> : vector<2x3xf32>
    %13 = tpu.matmul %10, %12, %cst_11 {dimension_numbers = #tpu.dot_dimension_numbers<[1], [0], [0], [1], [0, 0, 1, 1], [], []>} : vector<2x5xf32>, vector<5x3xf32>, vector<2x3xf32> -> vector<2x3xf32>
    %14 = arith.addf %9, %13 : vector<2x3xf32>
    %15 = vector.extract_strided_slice %5 {offsets = [2, 0], sizes = [2, 5], strides = [1, 1]} : vector<12x5xf32> to vector<2x5xf32>
    %c2 = arith.constant 2 : index
    %c0_12 = arith.constant 0 : index
    %c0_13 = arith.constant 0 : index
    %16 = vector.load %arg3[%c2, %c0_12, %c0_13] : memref<9x5x3xf32, #tpu.memory_space<vmem>>, vector<1x5x3xf32>
    %17 = vector.shape_cast %16 : vector<1x5x3xf32> to vector<5x3xf32>
    %cst_14 = arith.constant dense<0.000000e+00> : vector<2x3xf32>
    %18 = tpu.matmul %15, %17, %cst_14 {dimension_numbers = #tpu.dot_dimension_numbers<[1], [0], [0], [1], [0, 0, 1, 1], [], []>} : vector<2x5xf32>, vector<5x3xf32>, vector<2x3xf32> -> vector<2x3xf32>
    %19 = arith.addf %14, %18 : vector<2x3xf32>
    %20 = vector.extract_strided_slice %5 {offsets = [4, 0], sizes = [2, 5], strides = [1, 1]} : vector<12x5xf32> to vector<2x5xf32>
    %c3 = arith.constant 3 : index
    %c0_15 = arith.constant 0 : index
    %c0_16 = arith.constant 0 : index
    %21 = vector.load %arg3[%c3, %c0_15, %c0_16] : memref<9x5x3xf32, #tpu.memory_space<vmem>>, vector<1x5x3xf32>
    %22 = vector.shape_cast %21 : vector<1x5x3xf32> to vector<5x3xf32>
    %cst_17 = arith.constant dense<0.000000e+00> : vector<2x3xf32>
    %23 = tpu.matmul %20, %22, %cst_17 {dimension_numbers = #tpu.dot_dimension_numbers<[1], [0], [0], [1], [0, 0, 1, 1], [], []>} : vector<2x5xf32>, vector<5x3xf32>, vector<2x3xf32> -> vector<2x3xf32>
    %24 = arith.addf %19, %23 : vector<2x3xf32>
    %25 = vector.extract_strided_slice %5 {offsets = [5, 0], sizes = [2, 5], strides = [1, 1]} : vector<12x5xf32> to vector<2x5xf32>
    %c4 = arith.constant 4 : index
    %c0_18 = arith.constant 0 : index
    %c0_19 = arith.constant 0 : index
    %26 = vector.load %arg3[%c4, %c0_18, %c0_19] : memref<9x5x3xf32, #tpu.memory_space<vmem>>, vector<1x5x3xf32>
    %27 = vector.shape_cast %26 : vector<1x5x3xf32> to vector<5x3xf32>
    %cst_20 = arith.constant dense<0.000000e+00> : vector<2x3xf32>
    %28 = tpu.matmul %25, %27, %cst_20 {dimension_numbers = #tpu.dot_dimension_numbers<[1], [0], [0], [1], [0, 0, 1, 1], [], []>} : vector<2x5xf32>, vector<5x3xf32>, vector<2x3xf32> -> vector<2x3xf32>
    %29 = arith.addf %24, %28 : vector<2x3xf32>
    %30 = vector.extract_strided_slice %5 {offsets = [6, 0], sizes = [2, 5], strides = [1, 1]} : vector<12x5xf32> to vector<2x5xf32>
    %c5 = arith.constant 5 : index
    %c0_21 = arith.constant 0 : index
    %c0_22 = arith.constant 0 : index
    %31 = vector.load %arg3[%c5, %c0_21, %c0_22] : memref<9x5x3xf32, #tpu.memory_space<vmem>>, vector<1x5x3xf32>
    %32 = vector.shape_cast %31 : vector<1x5x3xf32> to vector<5x3xf32>
    %cst_23 = arith.constant dense<0.000000e+00> : vector<2x3xf32>
    %33 = tpu.matmul %30, %32, %cst_23 {dimension_numbers = #tpu.dot_dimension_numbers<[1], [0], [0], [1], [0, 0, 1, 1], [], []>} : vector<2x5xf32>, vector<5x3xf32>, vector<2x3xf32> -> vector<2x3xf32>
    %34 = arith.addf %29, %33 : vector<2x3xf32>
    %35 = vector.extract_strided_slice %5 {offsets = [8, 0], sizes = [2, 5], strides = [1, 1]} : vector<12x5xf32> to vector<2x5xf32>
    %c6 = arith.constant 6 : index
    %c0_24 = arith.constant 0 : index
    %c0_25 = arith.constant 0 : index
    %36 = vector.load %arg3[%c6, %c0_24, %c0_25] : memref<9x5x3xf32, #tpu.memory_space<vmem>>, vector<1x5x3xf32>
    %37 = vector.shape_cast %36 : vector<1x5x3xf32> to vector<5x3xf32>
    %cst_26 = arith.constant dense<0.000000e+00> : vector<2x3xf32>
    %38 = tpu.matmul %35, %37, %cst_26 {dimension_numbers = #tpu.dot_dimension_numbers<[1], [0], [0], [1], [0, 0, 1, 1], [], []>} : vector<2x5xf32>, vector<5x3xf32>, vector<2x3xf32> -> vector<2x3xf32>
    %39 = arith.addf %34, %38 : vector<2x3xf32>
    %40 = vector.extract_strided_slice %5 {offsets = [9, 0], sizes = [2, 5], strides = [1, 1]} : vector<12x5xf32> to vector<2x5xf32>
    %c7 = arith.constant 7 : index
    %c0_27 = arith.constant 0 : index
    %c0_28 = arith.constant 0 : index
    %41 = vector.load %arg3[%c7, %c0_27, %c0_28] : memref<9x5x3xf32, #tpu.memory_space<vmem>>, vector<1x5x3xf32>
    %42 = vector.shape_cast %41 : vector<1x5x3xf32> to vector<5x3xf32>
    %cst_29 = arith.constant dense<0.000000e+00> : vector<2x3xf32>
    %43 = tpu.matmul %40, %42, %cst_29 {dimension_numbers = #tpu.dot_dimension_numbers<[1], [0], [0], [1], [0, 0, 1, 1], [], []>} : vector<2x5xf32>, vector<5x3xf32>, vector<2x3xf32> -> vector<2x3xf32>
    %44 = arith.addf %39, %43 : vector<2x3xf32>
    %45 = vector.extract_strided_slice %5 {offsets = [10, 0], sizes = [2, 5], strides = [1, 1]} : vector<12x5xf32> to vector<2x5xf32>
    %c8 = arith.constant 8 : index
    %c0_30 = arith.constant 0 : index
    %c0_31 = arith.constant 0 : index
    %46 = vector.load %arg3[%c8, %c0_30, %c0_31] : memref<9x5x3xf32, #tpu.memory_space<vmem>>, vector<1x5x3xf32>
    %47 = vector.shape_cast %46 : vector<1x5x3xf32> to vector<5x3xf32>
    %cst_32 = arith.constant dense<0.000000e+00> : vector<2x3xf32>
    %48 = tpu.matmul %45, %47, %cst_32 {dimension_numbers = #tpu.dot_dimension_numbers<[1], [0], [0], [1], [0, 0, 1, 1], [], []>} : vector<2x5xf32>, vector<5x3xf32>, vector<2x3xf32> -> vector<2x3xf32>
    %49 = arith.addf %44, %48 : vector<2x3xf32>
    %c0_33 = arith.constant 0 : index
    %c0_34 = arith.constant 0 : index
    %50 = vector.load %arg4[%c0_33, %c0_34] : memref<1x3xf32, #tpu.memory_space<vmem>>, vector<1x3xf32>
    %51 = vector.broadcast %50 : vector<1x3xf32> to vector<2x3xf32>
    %52 = arith.addf %49, %51 : vector<2x3xf32>
    %c0_35 = arith.constant 0 : index
    %c0_36 = arith.constant 0 : index
    %53 = vector.load %arg5[%c0_35, %c0_36] : memref<2x3xf32, #tpu.memory_space<vmem>>, vector<2x3xf32>
    %54 = arith.mulf %52, %53 : vector<2x3xf32>
    %55 = vector.shape_cast %54 : vector<2x3xf32> to vector<1x2x3xf32>
    %cst_37 = arith.constant dense<0.000000e+00> : vector<1xf32>
    %56 = vector.multi_reduction <add>, %55, %cst_37 [1, 2] : vector<1x2x3xf32> to vector<1xf32>
    %57 = vector.shape_cast %56 : vector<1xf32> to vector<1x1x1xf32>
    %58 = vector.extract %57[0, 0, 0] : f32 from vector<1x1x1xf32>
    %59 = vector.broadcast %58 : f32 to vector<1x1xf32>
    %c0_38 = arith.constant 0 : index
    %c0_39 = arith.constant 0 : index
    %60 = vector.load %arg6[%c0_38, %c0_39] : memref<1x1xf32, #tpu.memory_space<vmem>>, vector<1x1xf32>
    %61 = arith.addf %59, %60 : vector<1x1xf32>
    %c0_40 = arith.constant 0 : index
    %c0_41 = arith.constant 0 : index
    %62 = vector.load %arg7[%c0_40, %c0_41] : memref<1x1xf32, #tpu.memory_space<vmem>>, vector<1x1xf32>
    tpu.vector_store %arg7[%c0_40, %c0_41], %61 {strides = array<i32>} : memref<1x1xf32, #tpu.memory_space<vmem>>, vector<1x1xf32>,
    return
  }
}

</mosaic_0001>

<bundles_post_ra>
// kernel: tpu_custom_call.1
= control target key start
LH: loop header
LB: loop body
LE: loop exit
PB: predicated region body
PF: predicated region fallthrough
CT: control target
= control target key end

     0   :  { %s1169_s0 = inlined_call_operand.vmem [shape: f32[12,27], index: 0, kind: input, shape index: {}]   ;;  %s1170_s1 = inlined_call_operand.vmem [shape: f32[27,5], index: 1, kind: input, shape index: {}]   ;;  %s1171_s2 = inlined_call_operand.vmem [shape: f32[1,5], index: 2, kind: input, shape index: {}]   ;;  %s1172_s3 = inlined_call_operand.vmem [shape: f32[9,5,3], index: 3, kind: input, shape index: {}]   ;;  %s1173_s4 = inlined_call_operand.vmem [shape: f32[1,3], index: 4, kind: input, shape index: {}]   ;;  %s1174_s5 = inlined_call_operand.vmem [shape: f32[2,3], index: 5, kind: input, shape index: {}]   ;;  %s1175_s6 = inlined_call_operand.<no memory space> [shape: f32[1,1], index: 6, kind: input, shape index: {}]   ;;  %s1176_s7 = inlined_call_operand.hbm [shape: f32[1,1], index: 7, kind: output, shape index: {}]  }
   0x1   :  { %v12_v0 = vstv %s1175_s6 }
   0x2   :  { %13 = vst [vmem:[#allocation2] sm:$0x1] %v12_v0 }
   0x3   :  { %v31_v1 = vld [vmem:[%s1170_s1] sm:$0xff]  ;;  %v32_v2 = vld [vmem:[%s1170_s1 + $0x8] sm:$0xff]  ;;  %v33_v3 = vld [vmem:[%s1170_s1 + $0x10] sm:$0xff]  ;;  %vm49_vm0 = vcmask 1042432   ;;  %vm42_vm1 = vcmask 220160   ;;  %vm1029_vm2 = vmmov 1  }
   0x4   :  { %v989_v4 = vpack.c.bf16 %v32_v2, %v31_v1  ;;  %v34_v5 = vld [vmem:[%s1170_s1 + $0x18] sm:$0x7]  ;;  %vm994_vm3 = vmpackc.low %vm49_vm0, %vm1029_vm2  ;;  %v29_v6 = vld [vmem:[%s1169_s0] sm:$0xff] }
   0x5   :  { %v993_v7 = vpack.c.bf16 %v34_v5, %v33_v3  ;;  %941 = vmatprep.mubr.msk.f32.mxu0 %vm42_vm1, %v29_v6 }
   0x6   :  { %14 = vsyncpa [#allocation4], 0  ;;  %990 = vmatprep.subr.bf16.mxu0 %v989_v4  ;;  %v30_v8 = vld [vmem:[%s1169_s0 + $0x8] sm:$0xf]  ;;  %vm136_vm4 = vcmask 1044480   ;;  %v1030_v10 = vmov 0.0  }
   0x7   :  { %992 = vmatpush3.bf16.msra.mxu0 %v989_v4  ;;  %v882_v9 = vld [vmem:[%s1172_s3 + $0x8] sm:$0x1f]  ;;  %944 = vmatprep.subr.mxu1 %v1030_v10  ;;  %v890_v11 = vld [vmem:[%s1172_s3 + $0x18] sm:$0x1f]  ;;  %vm1031_vm5 = vmmov 0   ;;  %vm133_vm6 = vcmask 39936  }
   0x8   :  { %995 = vmatprep.subr.msk.bf16.mxu0 %vm994_vm3, %v993_v7  ;;  %945 = vmatpush3.msk.msra.mxu1 %vm136_vm4, %v882_v9  ;;  %v878_v12 = vld [vmem:[%s1171_s2] ss:$0 sm:$0xff]  ;;  %v896_v19 = vld [vmem:[%s1172_s3 + $0x28] sm:$0x1f]  ;;  %v887_v21 = vld [vmem:[%s1172_s3 + $0x10] sm:$0x1f] }
   0x9   :  { %946 = vmatprep.mubr.msk.f32.mxu1 %vm1031_vm5, %v1030_v10  ;;  %949 = vmatprep.subr.mxu1 %v1030_v10  ;;  %v128_v17 = vld [vmem:[%s1172_s3] sm:$0x1f]  ;;  %v902_v23 = vld [vmem:[%s1172_s3 + $0x38] sm:$0x1f]  ;;  %v899_v28 = vld [vmem:[%s1172_s3 + $0x30] sm:$0x1f] }
   0xa   :  { %v893_v26 = vld [vmem:[%s1172_s3 + $0x20] sm:$0x1f]  ;;  %vm848_vm7 = vcmask 17408   ;;  %vm862_vm8 = vcmask 0  }
   0xb   :  { %998 = vmatpush3.bf16.msk.msra.mxu0 %vm994_vm3, %v993_v7  ;;  %v905_v29 = vld [vmem:[%s1172_s3 + $0x40] sm:$0x1f] }
   0xc   :  { %959 = vmatprep.subr.mxu0 %v1030_v10  ;;  %v908_v55 = vld [vmem:[%s1173_s4] ss:$0 sm:$0xff]  ;;  %s1032_s4 = smov [#allocation3]  }
   0xd   :  { %v846_v58 = vld [vmem:[%s1174_s5] sm:$0x3]  ;;  %s870_s6 = sshll.u32 %s1032_s4, 4  ;;  %s871_s6 = int_to_ptr.vmem [resolvable:$true] %s870_s6 }
   0xe   :  { %942 = vmatmul.mubr.msk.f32.vlgmr.msra.gmra.mrb[0].mxu0 %vm42_vm1, %v30_v8  ;;  %v860_v5 = vld [vmem:[#allocation2] sm:$0x1]  ;;  %s1005_s5 = scalar_lea.vmem %s871_s6, 16  ;;  %s1009_s12 = scalar_lea.vmem %s871_s6, 32 }
   0xf   :  { %960 = vmatpush3.msk.msra.mxu0 %vm136_vm4, %v890_v11  ;;  %961 = vmatprep.mubr.msk.f32.mxu0 %vm1031_vm5, %v1030_v10  ;;  %p1006_p0 = scmp.ne.s32.totalorder %s871_s6, %s1005_s5  ;;  %p1010_p1 = scmp.lt.s32.totalorder %s871_s6, %s871_s6 }
  0x10   :  { %969 = vmatprep.subr.mxu0 %v1030_v10  ;;  %p1011_p2 = scmp.lt.s32.totalorder %s1009_s12, %s1005_s5 }
  0x12   :  { %p1012_p3 = por %p1011_p2, %p1010_p1 }
  0x14   :  { %p1013_p4 = pnand %p1012_p3, %p1006_p0 }
  0xe1   :  { %v943_v13 = vpop.f32.mrb[0].mxu0 }
  0xe2   :  { %v119_v14 = vpop.f32.mrb[1].mxu0  ;;  %v125_v20 = vadd.f32 %v943_v13, %v878_v12 }
  0xe3   :  { %v120_v15 = vadd.f32 %v878_v12, %v119_v14 }
  0xe4   :  { %v682_v24 = vrot.slane %v125_v20, 1  ;;  %v761_v30 = vrot.slane %v125_v20, 2 }
  0xe5   :  { %v132_v16 = vrot.slane %v120_v15, 1  ;;  %v366_v18 = vrot.slane %v120_v15, 4  ;;  %v524_v22 = vrot.slane %v120_v15, 6  ;;  %v287_v25 = vrot.slane %v120_v15, 2 }
  0xe6   :  { %v445_v27 = vrot.slane %v120_v15, 5 }
  0xe7   :  { %947 = vmatmul.mubr.msk.f32.vlgmr.msra.gmra.mrb[0].mxu1 %vm133_vm6, %v132_v16  ;;  %962 = vmatmul.mubr.msk.f32.vlgmr.msra.gmra.mrb[2].mxu0 %vm133_vm6, %v366_v18 }
  0xe8   :  { %950 = vmatpush3.msk.msra.mxu1 %vm136_vm4, %v128_v17  ;;  %951 = vmatprep.mubr.msk.f32.mxu1 %vm1031_vm5, %v1030_v10 }
  0xe9   :  { %954 = vmatprep.subr.mxu1 %v1030_v10  ;;  %970 = vmatpush3.msk.msra.mxu0 %vm136_vm4, %v896_v19 }
  0xea   :  { %971 = vmatprep.mubr.msk.f32.mxu0 %vm1031_vm5, %v1030_v10  ;;  %979 = vmatprep.subr.mxu0 %v1030_v10 }
  0xeb   :  { %952 = vmatmul.mubr.msk.f32.vlgmr.msra.gmra.mrb[2].mxu1 %vm133_vm6, %v120_v15  ;;  %972 = vmatmul.mubr.msk.f32.vlgmr.msra.gmra.mrb[4].mxu0 %vm133_vm6, %v524_v22 }
  0xec   :  { %955 = vmatpush3.msk.msra.mxu1 %vm136_vm4, %v887_v21  ;;  %956 = vmatprep.mubr.msk.f32.mxu1 %vm1031_vm5, %v1030_v10 }
  0xed   :  { %964 = vmatprep.subr.mxu1 %v1030_v10  ;;  %980 = vmatpush3.msk.msra.mxu0 %vm136_vm4, %v902_v23 }
  0xee   :  { %981 = vmatprep.mubr.msk.f32.mxu0 %vm1031_vm5, %v1030_v10 }
  0xef   :  { %957 = vmatmul.mubr.msk.f32.vlgmr.msra.gmra.mrb[4].mxu1 %vm133_vm6, %v287_v25  ;;  %982 = vmatmul.mubr.msk.f32.vlgmr.msra.gmra.mrb[6].mxu0 %vm133_vm6, %v682_v24 }
  0xf0   :  { %965 = vmatpush3.msk.msra.mxu1 %vm136_vm4, %v893_v26  ;;  %966 = vmatprep.mubr.msk.f32.mxu1 %vm1031_vm5, %v1030_v10 }
  0xf1   :  { %974 = vmatprep.subr.mxu1 %v1030_v10 }
  0xf3   :  { %967 = vmatmul.mubr.msk.f32.vlgmr.msra.gmra.mrb[6].mxu1 %vm133_vm6, %v445_v27 }
  0xf4   :  { %975 = vmatpush3.msk.msra.mxu1 %vm136_vm4, %v899_v28  ;;  %976 = vmatprep.mubr.msk.f32.mxu1 %vm1031_vm5, %v1030_v10 }
  0xf5   :  { %984 = vmatprep.subr.mxu1 %v1030_v10 }
  0xf7   :  { %977 = vmatmul.mubr.msk.f32.vlgmr.msra.gmra.mrb[8].mxu1 %vm133_vm6, %v125_v20 }
  0xf8   :  { %985 = vmatpush3.msk.msra.mxu1 %vm136_vm4, %v905_v29  ;;  %986 = vmatprep.mubr.msk.f32.mxu1 %vm1031_vm5, %v1030_v10 }
  0xfb   :  { %987 = vmatmul.mubr.msk.f32.vlgmr.msra.gmra.mrb[10].mxu1 %vm133_vm6, %v761_v30 }
 0x1ba   :  { %v206_v31 = vpop.f32.mrb[0].mxu1  ;;  %v438_v32 = vpop.f32.mrb[2].mxu0 }
 0x1bb   :  { %v948_v33 = vpop.f32.mrb[1].mxu1  ;;  %v963_v34 = vpop.f32.mrb[3].mxu0 }
 0x1be   :  { %v281_v35 = vpop.f32.mrb[2].mxu1  ;;  %v596_v36 = vpop.f32.mrb[4].mxu0 }
 0x1bf   :  { %v282_v37 = vadd.f32 %v281_v35, %v206_v31  ;;  %v953_v38 = vpop.f32.mrb[3].mxu1  ;;  %v973_v39 = vpop.f32.mrb[5].mxu0 }
 0x1c2   :  { %v359_v40 = vpop.f32.mrb[4].mxu1  ;;  %v754_v41 = vpop.f32.mrb[6].mxu0 }
 0x1c3   :  { %v363_v42 = vadd.f32 %v359_v40, %v282_v37  ;;  %v958_v43 = vpop.f32.mrb[5].mxu1  ;;  %v983_v44 = vpop.f32.mrb[7].mxu0 }
 0x1c5   :  { %v442_v45 = vadd.f32 %v438_v32, %v363_v42 }
 0x1c6   :  { %v517_v46 = vpop.f32.mrb[6].mxu1 }
 0x1c7   :  { %v521_v47 = vadd.f32 %v517_v46, %v442_v45  ;;  %v968_v48 = vpop.f32.mrb[7].mxu1 }
 0x1c9   :  { %v600_v49 = vadd.f32 %v596_v36, %v521_v47 }
 0x1ca   :  { %v675_v50 = vpop.f32.mrb[8].mxu1 }
 0x1cb   :  { %v679_v51 = vadd.f32 %v675_v50, %v600_v49  ;;  %v978_v52 = vpop.f32.mrb[9].mxu1 }
 0x1cd   :  { %v758_v53 = vadd.f32 %v754_v41, %v679_v51 }
 0x1ce   :  { %v833_v54 = vpop.f32.mrb[10].mxu1 }
 0x1cf   :  { %v837_v56 = vadd.f32 %v833_v54, %v758_v53  ;;  %v988_v57 = vpop.f32.mrb[11].mxu1 }
 0x1d1   :  { %v845_v59 = vadd.f32 %v908_v55, %v837_v56 }
 0x1d3   :  { %v847_v60 = vmul.f32 %v846_v58, %v845_v59 }
 0x1d5   :  { %v849_v61 = vsel %vm848_vm7, %v847_v60, 0.0 }
 0x1d6   :  { %850 = vadd.xlane.f32.xlu0 %v849_v61 }
 0x263   :  { %v851_v62 = vpop.xlane.xlu0 %850 }
 0x264   :  { %v852_v63 = vrot.slane %v851_v62, 4 }
 0x266   :  { %v853_v0 = vadd.f32 %v852_v63, %v851_v62 }
 0x268   :  { %v854_v1 = vrot.slane %v853_v0, 2 }
 0x26a   :  { %v855_v2 = vadd.f32 %v854_v1, %v853_v0 }
 0x26c   :  { %v856_v3 = vrot.slane %v855_v2, 1 }
 0x26e   :  { %v857_v4 = vadd.f32 %v856_v3, %v855_v2 }
 0x270   :  { %999 = vpush %v857_v4 }
 0x2a1   :  { %s1000_s11 = spop %999 }
 0x2a2   :  { %v859_v6 = vstv %s1000_s11 }
 0x2a3   :  { %v861_v7 = vadd.f32 %v860_v5, %v859_v6 }
 0x2a5   :  { %863 = vst.msk [vmem:[#allocation3] sm:$0x1] %vm862_vm8, %v861_v7 }
 0x2a6   :  { %1016 = shalt.err (!%p1013_p4)
}
 0x2a7   :  { %s1017_s1 = scalar_lea.hbm %s1176_s7, 16 }
 0x2a8   :  { %p1018_p5 = scmp.ne.s32.totalorder %s1176_s7, %s1017_s1  ;;  %p1021_p6 = scmp.lt.u32.totalorder %s1017_s1, %s1176_s7 }
 0x2aa   :  { %p1023_p7 = pnand %p1021_p6, %p1018_p5 }
 0x2ac   :  { %1026 = shalt.err (!%p1023_p7)
}
 0x2ad   :  { %873 = dma.vmem_to_hbm [thread:$0]  %s871_s6, 16, %s1176_s7, [#allocation4]  }
 0x2ae   :  { %1027 = dma.done.wait [#allocation4], 16  }
 0x2af   :  { %1028 = vsyncadd [#allocation4], 4294967280 }
 0x2b0   :  { %877 = vsyncpa [#allocation4], 1 }

</bundles_post_ra>
